<compile_context>
chip_gen: v7x
topology: tpu7x:2x2x1
jax: 0.10.0
libtpu: 0.0.40
codegen_flags: <defaults>
</compile_context>

<pallas_src>
import itertools
import math

import jax
import jax.numpy as jnp
from jax.experimental import pallas as pl
from jax.experimental.pallas import tpu as pltpu

LN_EPS = 1e-5  # PyTorch nn.LayerNorm default


def _merge_ln_linear_kernel(x_ref, w_ref, b_ref, o_ref):
    """Fused 2x2x2 patch-merge + LayerNorm(8C) + Linear(8C -> Cout, no bias).

    x_ref : (tg, 2, th, 2, Wm, 2C)  [frames, D-parity, Hm rows, H-parity, Wm, W-parity*C]
    w_ref : (8C, Cout)              reduction weight^T with LN gamma pre-folded
    b_ref : (1, Cout)               beta @ W (LN beta folded through the matmul), f32
    o_ref : (tg, th*Wm, Cout)
    """
    xt = x_ref[...]
    tg, _, th, _, wm, c2 = xt.shape
    rows = tg * th * wm
    n_feat = 4 * c2                       # 8C
    inv_n = 1.0 / n_feat
    c_out = o_ref.shape[-1]

    def get_slice(s):
        # torch concat slot m = 4*i + 2*j + k; the k-pair is already contiguous
        # in the last (2C) axis, so slice s = 2*i + j covers weight rows
        # [s*2C, (s+1)*2C).
        i, j = s // 2, s % 2
        return xt[:, i, :, j].reshape(rows, c2).astype(jnp.float32)

    # Pass 1: per-row sum and sum-of-squares over the 8C merged features
    # (f32 stats: required on v5e's non-bf16 VPU, cheap everywhere).
    tot = jnp.zeros((rows, 1), jnp.float32)
    tot_sq = jnp.zeros((rows, 1), jnp.float32)
    for s in range(4):
        xs = get_slice(s)
        tot = tot + jnp.sum(xs, axis=-1, keepdims=True)
        tot_sq = tot_sq + jnp.sum(xs * xs, axis=-1, keepdims=True)
    mean = tot * inv_n
    var = jnp.maximum(tot_sq * inv_n - mean * mean, 0.0)
    rstd = jax.lax.rsqrt(var + LN_EPS)

    # Pass 2: normalize each (rows, 2C) slice and accumulate four K-chunked MXU
    # calls into one f32 accumulator (no lane-axis concat, ~4x smaller f32
    # temporaries).  MXU operands are fed in the weight's storage dtype.
    acc = jnp.zeros((rows, c_out), jnp.float32)
    for s in range(4):
        xn = (get_slice(s) - mean) * rstd
        acc = acc + jnp.dot(xn.astype(w_ref.dtype),
                            w_ref[s * c2:(s + 1) * c2, :],
                            preferred_element_type=jnp.float32)
    y = acc + b_ref[...].astype(jnp.float32)
    o_ref[...] = y.reshape(tg, th * wm, c_out).astype(o_ref.dtype)


def patch_merging_v2(x, gamma, beta, w_t, *, vmem_budget_bytes=36 * 2**20):
    """Forward of PatchMergingV2 (spatial_dims=3).

    x     : (B, D, H, W, C) channels-last
    gamma : (8C,) or (1, 8C)  LayerNorm weight
    beta  : (8C,) or (1, 8C)  LayerNorm bias
    w_t   : (8C, 2C) == torch Linear(8C, 2C, bias=False).weight.T
    returns (B, ceil(D/2), ceil(H/2), ceil(W/2), 2C)
    """
    # TODO(synk): the spatial_dims=2 (4-D input) branch of the module is not
    # implemented; only the 3-D merge is kerneled.
    b, d, h, w, c = x.shape
    if (d % 2) or (h % 2) or (w % 2):  # matches F.pad(x, (0,0, 0,w%2, 0,h%2, 0,d%2))
        x = jnp.pad(x, ((0, 0), (0, d % 2), (0, h % 2), (0, w % 2), (0, 0)))
        b, d, h, w, c = x.shape
    dm, hm, wm = d // 2, h // 2, w // 2
    c2, c8 = 2 * c, 8 * c
    c_out = w_t.shape[1]

    # Free (no-copy) reshape exposing the three merge parities:
    #   (B*Dm, D-parity, Hm, H-parity, Wm, W-parity*C)
    xr = x.reshape(b * dm, 2, hm, 2, wm, c2)

    # Fold the LayerNorm affine into the matmul parameters; the weight stays in
    # its compact storage dtype (bf16 weights -> bf16 MXU path, half-size
    # resident weight buffers in VMEM).
    gamma = gamma.reshape(c8).astype(jnp.float32)
    beta = beta.reshape(c8).astype(jnp.float32)
    w_f32 = w_t.astype(jnp.float32)
    w_eff = (gamma[:, None] * w_f32).astype(w_t.dtype)              # (8C, Cout)
    b_eff = jnp.matmul(beta[None, :], w_f32,
                       precision=jax.lax.Precision.HIGHEST)         # (1, Cout) f32

    in_bytes = jnp.dtype(x.dtype).itemsize
    out_bytes = in_bytes
    w_bytes = jnp.dtype(w_eff.dtype).itemsize

    # --- Tile-size policy: memory-bound op -> maximize rows per grid step ---
    def vmem_footprint(rows):
        return (2 * rows * c8 * in_bytes          # double-buffered input block
                + 2 * rows * c_out * out_bytes    # double-buffered output block
                + 2 * c8 * c_out * w_bytes        # resident weight (2 buffers)
                + rows * (c2 + c_out + 16) * 4)   # f32 slice / acc / stats temps

    target_rows = 2048 if in_bytes <= 2 else 1024
    while target_rows > 128 and vmem_footprint(target_rows) > vmem_budget_bytes:
        target_rows //= 2

    frames = b * dm
    if hm * wm >= target_rows:
        # Large spatial extent: one frame per step; tile the Hm axis so the
        # flattened row count stays sublane-aligned (th*Wm % 8 == 0, or th==Hm).
        tg = 1
        align = 8 // math.gcd(wm, 8)
        th = max(align, (target_rows // max(wm, 1)) // align * align)
        th = min(th, hm)
    else:
        # Deep stages (small Dm/Hm/Wm): pack several frames per step so each
        # DMA / MXU call still sees ~target_rows rows.
        th = hm
        tg = max(1, min(frames, target_rows // (hm * wm)))

    # Keep at least two grid steps when possible so v7x's two TensorCores both
    # get work (both grid axes are "parallel").
    if frames >= 2 and pl.cdiv(frames, tg) < 2 and pl.cdiv(hm, th) < 2:
        tg = (frames + 1) // 2

    rows_tile = tg * th * wm
    grid = (pl.cdiv(frames, tg), pl.cdiv(hm, th))

    rows_total = frames * hm * wm
    cost = pl.CostEstimate(
        flops=2 * rows_total * c8 * c_out,
        transcendentals=rows_total,
        bytes_accessed=rows_total * (c8 * in_bytes + c_out * out_bytes)
        + c8 * c_out * w_bytes,
    )
    vmem_limit = int(min(56 * 2**20,
                         max(32 * 2**20, int(1.5 * vmem_footprint(rows_tile)))))

    # TODO(synk): for c_out < 128 (e.g. SwinUNETR feature_size=48 -> c_out=96)
    # the output stores are lane-masked; a lane-dense (Wm*c_out) output slab
    # would avoid that at the cost of an in-kernel relayout.
    out = pl.pallas_call(
        _merge_ln_linear_kernel,
        out_shape=jax.ShapeDtypeStruct((frames, hm * wm, c_out), x.dtype),
        grid=grid,
        in_specs=[
            # One parity-carrying activation block per step; last two block
            # dims are the full (Wm, 2C) array dims, so the (8,128) rule holds
            # for any shape.
            pl.BlockSpec((tg, 2, th, 2, wm, c2),
                         lambda g, t: (g, 0, t, 0, 0, 0)),
            pl.BlockSpec((c8, c_out), lambda g, t: (0, 0)),   # resident weight
            pl.BlockSpec((1, c_out), lambda g, t: (0, 0)),    # resident bias
        ],
        out_specs=pl.BlockSpec((tg, th * wm, c_out),
                               lambda g, t: (g, t, 0)),
        compiler_params=pltpu.CompilerParams(
            dimension_semantics=("parallel", "parallel"),
            vmem_limit_bytes=vmem_limit),
        cost_estimate=cost,
    )(xr, w_eff, b_eff)

    return out.reshape(b, dm, hm, wm, c_out)


if __name__ == "__main__":
    # Small, TPU-friendly shapes: C=64 -> 8C=512 (lane-dense), 2C=128 output
    # (unmasked stores), Wm=8 (sublane-aligned in-kernel row collapse).
    B, D, H, W, C = 2, 4, 8, 16, 64
    key = jax.random.PRNGKey(0)
    kx, kw, kg, kb = jax.random.split(key, 4)

    x = jax.random.normal(kx, (B, D, H, W, C), dtype=jnp.float32)
    gamma = 1.0 + 0.01 * jax.random.normal(kg, (8 * C,), jnp.float32)
    beta = 0.01 * jax.random.normal(kb, (8 * C,), jnp.float32)
    # torch Linear(8C, 2C, bias=False).weight has shape (2C, 8C); kernel takes W^T.
    w = 0.02 * jax.random.normal(kw, (2 * C, 8 * C), jnp.float32)
    w_t = w.T                                                  # (8C, 2C)

    out = jax.jit(patch_merging_v2)(x, gamma, beta, w_t)
    jax.block_until_ready(out)

    # Plain-JAX reference replicating the PyTorch forward exactly.
    parts = [x[:, i::2, j::2, k::2, :]
             for i, j, k in itertools.product(range(2), range(2), range(2))]
    xm = jnp.concatenate(parts, axis=-1)
    mu = jnp.mean(xm, axis=-1, keepdims=True)
    var = jnp.mean((xm - mu) ** 2, axis=-1, keepdims=True)
    xn = (xm - mu) / jnp.sqrt(var + LN_EPS)
    ref = jnp.einsum("...i,io->...o", xn * gamma + beta, w_t,
                     precision=jax.lax.Precision.HIGHEST)

    assert out.shape == (B, D // 2, H // 2, W // 2, 2 * C), out.shape
    assert jnp.allclose(out, ref, atol=1e-3, rtol=1e-3), (
        float(jnp.max(jnp.abs(out - ref))))
    print("KERNEL_OK")
</pallas_src>

<mosaic_0001>
module attributes {stable_mosaic.version = 11 : i64} {
  func.func @_merge_ln_linear_kernel(%arg0: i32, %arg1: i32, %arg2: memref<2x2x4x2x8x128xf32, #tpu.memory_space<vmem>>, %arg3: memref<512x128xf32, #tpu.memory_space<vmem>>, %arg4: memref<1x128xf32, #tpu.memory_space<vmem>>, %arg5: memref<2x32x128xf32, #tpu.memory_space<vmem>>) attributes {dimension_semantics = [#tpu.dimension_semantics<parallel>, #tpu.dimension_semantics<parallel>], iteration_bounds = array<i64: 2, 1>, scalar_prefetch = 0 : i64, scratch_operands = 0 : i64, tpu.core_type = #tpu.core_type<tc>, window_params = [{transform_indices = @transform_0, window_bounds = array<i64: 2, 2, 4, 2, 8, 128>}, {pipeline_mode = #tpu.pipeline_mode<synchronous>, transform_indices = @transform_1, window_bounds = array<i64: 512, 128>}, {pipeline_mode = #tpu.pipeline_mode<synchronous>, transform_indices = @transform_2, window_bounds = array<i64: 1, 128>}, {transform_indices = @transform_3, window_bounds = array<i64: 2, 32, 128>}]} {
    %c0 = arith.constant 0 : index
    %c0_0 = arith.constant 0 : index
    %c0_1 = arith.constant 0 : index
    %c0_2 = arith.constant 0 : index
    %c0_3 = arith.constant 0 : index
    %c0_4 = arith.constant 0 : index
    %0 = vector.load %arg2[%c0, %c0_0, %c0_1, %c0_2, %c0_3, %c0_4] : memref<2x2x4x2x8x128xf32, #tpu.memory_space<vmem>>, vector<2x2x4x2x8x128xf32>
    %cst = arith.constant 0.000000e+00 : f32
    %1 = vector.broadcast %cst : f32 to vector<64x1xf32>
    %cst_5 = arith.constant 0.000000e+00 : f32
    %2 = vector.broadcast %cst_5 : f32 to vector<64x1xf32>
    %3 = vector.extract_strided_slice %0 {offsets = [0, 0, 0, 0, 0, 0], sizes = [2, 1, 4, 1, 8, 128], strides = [1, 1, 1, 1, 1, 1]} : vector<2x2x4x2x8x128xf32> to vector<2x1x4x1x8x128xf32>
    %4 = vector.shape_cast %3 : vector<2x1x4x1x8x128xf32> to vector<2x4x8x128xf32>
    %5 = vector.shape_cast %4 : vector<2x4x8x128xf32> to vector<64x128xf32>
    %cst_6 = arith.constant dense<0.000000e+00> : vector<64xf32>
    %6 = vector.multi_reduction <add>, %5, %cst_6 [1] : vector<64x128xf32> to vector<64xf32>
    %7 = vector.shape_cast %6 : vector<64xf32> to vector<64x1xf32>
    %8 = arith.addf %1, %7 : vector<64x1xf32>
    %9 = arith.mulf %5, %5 : vector<64x128xf32>
    %cst_7 = arith.constant dense<0.000000e+00> : vector<64xf32>
    %10 = vector.multi_reduction <add>, %9, %cst_7 [1] : vector<64x128xf32> to vector<64xf32>
    %11 = vector.shape_cast %10 : vector<64xf32> to vector<64x1xf32>
    %12 = arith.addf %2, %11 : vector<64x1xf32>
    %13 = vector.extract_strided_slice %0 {offsets = [0, 0, 0, 1, 0, 0], sizes = [2, 1, 4, 1, 8, 128], strides = [1, 1, 1, 1, 1, 1]} : vector<2x2x4x2x8x128xf32> to vector<2x1x4x1x8x128xf32>
    %14 = vector.shape_cast %13 : vector<2x1x4x1x8x128xf32> to vector<2x4x8x128xf32>
    %15 = vector.shape_cast %14 : vector<2x4x8x128xf32> to vector<64x128xf32>
    %cst_8 = arith.constant dense<0.000000e+00> : vector<64xf32>
    %16 = vector.multi_reduction <add>, %15, %cst_8 [1] : vector<64x128xf32> to vector<64xf32>
    %17 = vector.shape_cast %16 : vector<64xf32> to vector<64x1xf32>
    %18 = arith.addf %8, %17 : vector<64x1xf32>
    %19 = arith.mulf %15, %15 : vector<64x128xf32>
    %cst_9 = arith.constant dense<0.000000e+00> : vector<64xf32>
    %20 = vector.multi_reduction <add>, %19, %cst_9 [1] : vector<64x128xf32> to vector<64xf32>
    %21 = vector.shape_cast %20 : vector<64xf32> to vector<64x1xf32>
    %22 = arith.addf %12, %21 : vector<64x1xf32>
    %23 = vector.extract_strided_slice %0 {offsets = [0, 1, 0, 0, 0, 0], sizes = [2, 1, 4, 1, 8, 128], strides = [1, 1, 1, 1, 1, 1]} : vector<2x2x4x2x8x128xf32> to vector<2x1x4x1x8x128xf32>
    %24 = vector.shape_cast %23 : vector<2x1x4x1x8x128xf32> to vector<2x4x8x128xf32>
    %25 = vector.shape_cast %24 : vector<2x4x8x128xf32> to vector<64x128xf32>
    %cst_10 = arith.constant dense<0.000000e+00> : vector<64xf32>
    %26 = vector.multi_reduction <add>, %25, %cst_10 [1] : vector<64x128xf32> to vector<64xf32>
    %27 = vector.shape_cast %26 : vector<64xf32> to vector<64x1xf32>
    %28 = arith.addf %18, %27 : vector<64x1xf32>
    %29 = arith.mulf %25, %25 : vector<64x128xf32>
    %cst_11 = arith.constant dense<0.000000e+00> : vector<64xf32>
    %30 = vector.multi_reduction <add>, %29, %cst_11 [1] : vector<64x128xf32> to vector<64xf32>
    %31 = vector.shape_cast %30 : vector<64xf32> to vector<64x1xf32>
    %32 = arith.addf %22, %31 : vector<64x1xf32>
    %33 = vector.extract_strided_slice %0 {offsets = [0, 1, 0, 1, 0, 0], sizes = [2, 1, 4, 1, 8, 128], strides = [1, 1, 1, 1, 1, 1]} : vector<2x2x4x2x8x128xf32> to vector<2x1x4x1x8x128xf32>
    %34 = vector.shape_cast %33 : vector<2x1x4x1x8x128xf32> to vector<2x4x8x128xf32>
    %35 = vector.shape_cast %34 : vector<2x4x8x128xf32> to vector<64x128xf32>
    %cst_12 = arith.constant dense<0.000000e+00> : vector<64xf32>
    %36 = vector.multi_reduction <add>, %35, %cst_12 [1] : vector<64x128xf32> to vector<64xf32>
    %37 = vector.shape_cast %36 : vector<64xf32> to vector<64x1xf32>
    %38 = arith.addf %28, %37 : vector<64x1xf32>
    %39 = arith.mulf %35, %35 : vector<64x128xf32>
    %cst_13 = arith.constant dense<0.000000e+00> : vector<64xf32>
    %40 = vector.multi_reduction <add>, %39, %cst_13 [1] : vector<64x128xf32> to vector<64xf32>
    %41 = vector.shape_cast %40 : vector<64xf32> to vector<64x1xf32>
    %42 = arith.addf %32, %41 : vector<64x1xf32>
    %cst_14 = arith.constant 0.001953125 : f32
    %43 = vector.broadcast %cst_14 : f32 to vector<64x1xf32>
    %44 = arith.mulf %38, %43 : vector<64x1xf32>
    %cst_15 = arith.constant 0.001953125 : f32
    %45 = vector.broadcast %cst_15 : f32 to vector<64x1xf32>
    %46 = arith.mulf %42, %45 : vector<64x1xf32>
    %47 = arith.mulf %44, %44 : vector<64x1xf32>
    %48 = arith.subf %46, %47 : vector<64x1xf32>
    %cst_16 = arith.constant 0.000000e+00 : f32
    %49 = vector.broadcast %cst_16 : f32 to vector<64x1xf32>
    %50 = arith.maximumf %48, %49 : vector<64x1xf32>
    %cst_17 = arith.constant 9.99999974E-6 : f32
    %51 = vector.broadcast %cst_17 : f32 to vector<64x1xf32>
    %52 = arith.addf %50, %51 : vector<64x1xf32>
    %53 = math.rsqrt %52 : vector<64x1xf32>
    %cst_18 = arith.constant 0.000000e+00 : f32
    %54 = vector.broadcast %cst_18 : f32 to vector<64x128xf32>
    %55 = vector.extract_strided_slice %0 {offsets = [0, 0, 0, 0, 0, 0], sizes = [2, 1, 4, 1, 8, 128], strides = [1, 1, 1, 1, 1, 1]} : vector<2x2x4x2x8x128xf32> to vector<2x1x4x1x8x128xf32>
    %56 = vector.shape_cast %55 : vector<2x1x4x1x8x128xf32> to vector<2x4x8x128xf32>
    %57 = vector.shape_cast %56 : vector<2x4x8x128xf32> to vector<64x128xf32>
    %58 = vector.broadcast %44 : vector<64x1xf32> to vector<64x128xf32>
    %59 = arith.subf %57, %58 : vector<64x128xf32>
    %60 = vector.broadcast %53 : vector<64x1xf32> to vector<64x128xf32>
    %61 = arith.mulf %59, %60 : vector<64x128xf32>
    %c0_19 = arith.constant 0 : index
    %c0_20 = arith.constant 0 : index
    %62 = vector.load %arg3[%c0_19, %c0_20] : memref<512x128xf32, #tpu.memory_space<vmem>>, vector<128x128xf32>
    %cst_21 = arith.constant dense<0.000000e+00> : vector<64x128xf32>
    %63 = tpu.matmul %61, %62, %cst_21 {dimension_numbers = #tpu.dot_dimension_numbers<[1], [0], [0], [1], [0, 0, 1, 1], [], []>} : vector<64x128xf32>, vector<128x128xf32>, vector<64x128xf32> -> vector<64x128xf32>
    %64 = arith.addf %54, %63 : vector<64x128xf32>
    %65 = vector.extract_strided_slice %0 {offsets = [0, 0, 0, 1, 0, 0], sizes = [2, 1, 4, 1, 8, 128], strides = [1, 1, 1, 1, 1, 1]} : vector<2x2x4x2x8x128xf32> to vector<2x1x4x1x8x128xf32>
    %66 = vector.shape_cast %65 : vector<2x1x4x1x8x128xf32> to vector<2x4x8x128xf32>
    %67 = vector.shape_cast %66 : vector<2x4x8x128xf32> to vector<64x128xf32>
    %68 = vector.broadcast %44 : vector<64x1xf32> to vector<64x128xf32>
    %69 = arith.subf %67, %68 : vector<64x128xf32>
    %70 = vector.broadcast %53 : vector<64x1xf32> to vector<64x128xf32>
    %71 = arith.mulf %69, %70 : vector<64x128xf32>
    %c128 = arith.constant 128 : index
    %c0_22 = arith.constant 0 : index
    %72 = vector.load %arg3[%c128, %c0_22] : memref<512x128xf32, #tpu.memory_space<vmem>>, vector<128x128xf32>
    %cst_23 = arith.constant dense<0.000000e+00> : vector<64x128xf32>
    %73 = tpu.matmul %71, %72, %cst_23 {dimension_numbers = #tpu.dot_dimension_numbers<[1], [0], [0], [1], [0, 0, 1, 1], [], []>} : vector<64x128xf32>, vector<128x128xf32>, vector<64x128xf32> -> vector<64x128xf32>
    %74 = arith.addf %64, %73 : vector<64x128xf32>
    %75 = vector.extract_strided_slice %0 {offsets = [0, 1, 0, 0, 0, 0], sizes = [2, 1, 4, 1, 8, 128], strides = [1, 1, 1, 1, 1, 1]} : vector<2x2x4x2x8x128xf32> to vector<2x1x4x1x8x128xf32>
    %76 = vector.shape_cast %75 : vector<2x1x4x1x8x128xf32> to vector<2x4x8x128xf32>
    %77 = vector.shape_cast %76 : vector<2x4x8x128xf32> to vector<64x128xf32>
    %78 = vector.broadcast %44 : vector<64x1xf32> to vector<64x128xf32>
    %79 = arith.subf %77, %78 : vector<64x128xf32>
    %80 = vector.broadcast %53 : vector<64x1xf32> to vector<64x128xf32>
    %81 = arith.mulf %79, %80 : vector<64x128xf32>
    %c256 = arith.constant 256 : index
    %c0_24 = arith.constant 0 : index
    %82 = vector.load %arg3[%c256, %c0_24] : memref<512x128xf32, #tpu.memory_space<vmem>>, vector<128x128xf32>
    %cst_25 = arith.constant dense<0.000000e+00> : vector<64x128xf32>
    %83 = tpu.matmul %81, %82, %cst_25 {dimension_numbers = #tpu.dot_dimension_numbers<[1], [0], [0], [1], [0, 0, 1, 1], [], []>} : vector<64x128xf32>, vector<128x128xf32>, vector<64x128xf32> -> vector<64x128xf32>
    %84 = arith.addf %74, %83 : vector<64x128xf32>
    %85 = vector.extract_strided_slice %0 {offsets = [0, 1, 0, 1, 0, 0], sizes = [2, 1, 4, 1, 8, 128], strides = [1, 1, 1, 1, 1, 1]} : vector<2x2x4x2x8x128xf32> to vector<2x1x4x1x8x128xf32>
    %86 = vector.shape_cast %85 : vector<2x1x4x1x8x128xf32> to vector<2x4x8x128xf32>
    %87 = vector.shape_cast %86 : vector<2x4x8x128xf32> to vector<64x128xf32>
    %88 = vector.broadcast %44 : vector<64x1xf32> to vector<64x128xf32>
    %89 = arith.subf %87, %88 : vector<64x128xf32>
    %90 = vector.broadcast %53 : vector<64x1xf32> to vector<64x128xf32>
    %91 = arith.mulf %89, %90 : vector<64x128xf32>
    %c384 = arith.constant 384 : index
    %c0_26 = arith.constant 0 : index
    %92 = vector.load %arg3[%c384, %c0_26] : memref<512x128xf32, #tpu.memory_space<vmem>>, vector<128x128xf32>
    %cst_27 = arith.constant dense<0.000000e+00> : vector<64x128xf32>
    %93 = tpu.matmul %91, %92, %cst_27 {dimension_numbers = #tpu.dot_dimension_numbers<[1], [0], [0], [1], [0, 0, 1, 1], [], []>} : vector<64x128xf32>, vector<128x128xf32>, vector<64x128xf32> -> vector<64x128xf32>
    %94 = arith.addf %84, %93 : vector<64x128xf32>
    %c0_28 = arith.constant 0 : index
    %c0_29 = arith.constant 0 : index
    %95 = vector.load %arg4[%c0_28, %c0_29] : memref<1x128xf32, #tpu.memory_space<vmem>>, vector<1x128xf32>
    %96 = vector.broadcast %95 : vector<1x128xf32> to vector<64x128xf32>
    %97 = arith.addf %94, %96 : vector<64x128xf32>
    %98 = vector.shape_cast %97 : vector<64x128xf32> to vector<2x32x128xf32>
    %c0_30 = arith.constant 0 : index
    %c0_31 = arith.constant 0 : index
    %c0_32 = arith.constant 0 : index
    %99 = vector.load %arg5[%c0_30, %c0_31, %c0_32] : memref<2x32x128xf32, #tpu.memory_space<vmem>>, vector<2x32x128xf32>
    tpu.vector_store %arg5[%c0_30, %c0_31, %c0_32], %98 {strides = array<i32>} : memref<2x32x128xf32, #tpu.memory_space<vmem>>, vector<2x32x128xf32>,
    return
  }
  func.func @transform_0(%arg0: i32, %arg1: i32) -> (i32, i32, i32, i32, i32, i32) {
    %c0_i32 = arith.constant 0 : i32
    %c0_i32_0 = arith.constant 0 : i32
    %c0_i32_1 = arith.constant 0 : i32
    %c0_i32_2 = arith.constant 0 : i32
    %c0_i32_3 = arith.constant 0 : i32
    return %arg0, %c0_i32, %arg1, %c0_i32_0, %c0_i32_1, %c0_i32_2 : i32, i32, i32, i32, i32, i32
  }
  func.func @transform_1(%arg0: i32, %arg1: i32) -> (i32, i32) {
    %c0_i32 = arith.constant 0 : i32
    %c0_i32_0 = arith.constant 0 : i32
    %c0_i32_1 = arith.constant 0 : i32
    return %c0_i32, %c0_i32_0 : i32, i32
  }
  func.func @transform_2(%arg0: i32, %arg1: i32) -> (i32, i32) {
    %c0_i32 = arith.constant 0 : i32
    %c0_i32_0 = arith.constant 0 : i32
    %c0_i32_1 = arith.constant 0 : i32
    return %c0_i32, %c0_i32_0 : i32, i32
  }
  func.func @transform_3(%arg0: i32, %arg1: i32) -> (i32, i32, i32) {
    %c0_i32 = arith.constant 0 : i32
    %c0_i32_0 = arith.constant 0 : i32
    return %arg0, %arg1, %c0_i32 : i32, i32, i32
  }
}

</mosaic_0001>

<bundles_post_ra>
// kernel: patch_merging_v2.1
= control target key start
LH: loop header
LB: loop body
LE: loop exit
PB: predicated region body
PF: predicated region fallthrough
CT: control target
= control target key end

     0   :  { %8 = vsyncpa [#allocation3], 0  ;;  %s2505_s0 = inlined_call_operand.vmem [shape: f32[4,2,4,2,8,128], index: 0, kind: input, shape index: {}]   ;;  %s2506_s1 = inlined_call_operand.vmem [shape: f32[512,128], index: 1, kind: input, shape index: {}]   ;;  %s2507_s2 = inlined_call_operand.vmem [shape: f32[1,128], index: 2, kind: input, shape index: {}]   ;;  %s2508_s3 = inlined_call_operand.hbm [shape: f32[4,32,128], index: 3, kind: output, shape index: {}]  }
   0x1   :  { %10 = vsyncpa [#allocation3 + $0x1], 0  ;;  %s1826_s12 = smov 0   ;;  %s1828_s13 = smov 0  }
   0x2   :  { %s1830_s14 = smov 0   ;;  %s1832_s15 = smov 0  }
   0x3   :  { %s1834_s16 = smov 0   ;;  %s1836_s17 = smov 0  }
   0x4 LB: > { %s1207_s18 = sadd.s32 4294967295, %s1801_s17   ;;  %s1208_s19 = sadd.s32 4294967294, %s1801_s17   ;;  %s1801_s17 = sphi %s1836_s17, %s16_s17   ;;  %s1797_s16 = sphi %s1834_s16, %s2518_s16   ;;  %s1793_s15 = sphi %s1832_s15, %s2517_s15   ;;  %s1789_s14 = sphi %s1830_s14, %s2516_s14   ;;  %s1785_s13 = sphi %s1828_s13, %s2515_s13   ;;  %s1781_s12 = sphi %s1826_s12, %s2514_s12  }
   0x5   : > { %s28_s20 = sadd.s32 1, %s1797_s16  ;;  %s107_s21 = sadd.s32 1, %s1789_s14 }
   0x6   : > { %p30_p0 = scmp.ge.s32.totalorder %s28_s20, 2  ;;  %p117_p1 = scmp.ne.s32.totalorder %s1789_s14, %s1785_s13 }
   0x7   : > { %p118_p2 = scmp.eq.s32.totalorder %s1207_s18, 1  ;;  %p123_p3 = scmp.ne.s32.totalorder %s1785_s13, %s1781_s12 }
   0x8   : > { %s2520_s20 = smov (%p30_p0, %s28_s20), 0  ;;  %p124_p5 = scmp.eq.s32.totalorder %s1208_s19, 1 }
   0x9   : > { %p1866_p4 = por %p118_p2, %p117_p1  ;;  %s102_s23 = ssub.s32 %s1797_s16, %s2520_s20 }
   0xa   : > { %p1211_p6 = scmp.ge.s32.totalorder %s1801_s17, 1  ;;  %p105_p7 = scmp.eq.s32.totalorder %s102_s23, 0 }
   0xb   : > { %p1873_p8 = por %p124_p5, %p123_p3  ;;  %p164_p9 = scmp.lt.s32.totalorder %s1801_s17, 3 }
   0xc   : > { %s1879_s25 = scalar_select %p105_p7, %s1789_s14, %s107_s21  }
   0xd   : > { %p165_p10 = pnand %p1211_p6, %p164_p9 }
   0xf   : > { %168 = sbr.rel (%p165_p10) target bundleno = 568 (0x238), region = 32 }
  0x16   : > { %s1213_s26 = sshll.u32 %s1793_s15, 1  ;;  %v569_v18 = vld [vmem:[%s2506_s1 + $0x80] sm:$0xff]  ;;  %v570_v19 = vld [vmem:[%s2506_s1 + $0x88] sm:$0xff]  ;;  %v571_v26 = vld [vmem:[%s2506_s1 + $0x90] sm:$0xff]  ;;  %s1225_s5 = sshll.u32 %s1793_s15, 10 }
  0x17   : > { %p196_p11 = scmp.lt.s32.totalorder %s1213_s26, 3  ;;  %v811_v20 = vld [vmem:[%s2506_s1 + $0x100] sm:$0xff]  ;;  %v1498_v21 = vpack.c.bf16 %v570_v19, %v569_v18  ;;  %v812_v22 = vld [vmem:[%s2506_s1 + $0x108] sm:$0xff]  ;;  %v572_v27 = vld [vmem:[%s2506_s1 + $0x98] sm:$0xff]  ;;  %s2451_s8 = scalar_lea.hbm %s2508_s3, %s1225_s5 }
  0x18   : > { %v1562_v25 = vpack.c.bf16 %v812_v22, %v811_v20  ;;  %v813_v28 = vld [vmem:[%s2506_s1 + $0x110] sm:$0xff]  ;;  %v1502_v31 = vpack.c.bf16 %v572_v27, %v571_v26  ;;  %v814_v32 = vld [vmem:[%s2506_s1 + $0x118] sm:$0xff]  ;;  %v573_v35 = vld [vmem:[%s2506_s1 + $0xa0] sm:$0xff]  ;;  %s1803_s10 = smov [#allocation2]  }
  0x19   : > { %s2522_s26 = smov (!%p196_p11, %s1213_s26), 3  ;;  %1499 = vmatprep.subr.bf16.mxu1 %v1498_v21  ;;  %v1566_v33 = vpack.c.bf16 %v814_v32, %v813_v28  ;;  %v574_v36 = vld [vmem:[%s2506_s1 + $0xa8] sm:$0xff]  ;;  %v815_v37 = vld [vmem:[%s2506_s1 + $0x120] sm:$0xff]  ;;  %v575_v43 = vld [vmem:[%s2506_s1 + $0xb0] sm:$0xff]  ;;  %s1727_s11 = sshll.u32 %s1803_s10, 4  ;;  %s1728_s11 = int_to_ptr.vmem [resolvable:$false] %s1727_s11 }
  0x1a   : > { %s1223_s27 = sshll.u32 %s2522_s26, 7  ;;  %1563 = vmatprep.subr.bf16.mxu0 %v1562_v25  ;;  %1501 = vmatpush3.bf16.msra.mxu1 %v1498_v21  ;;  %v1506_v39 = vpack.c.bf16 %v574_v36, %v573_v35  ;;  %v816_v40 = vld [vmem:[%s2506_s1 + $0x128] sm:$0xff]  ;;  %v576_v44 = vld [vmem:[%s2506_s1 + $0xb8] sm:$0xff]  ;;  %v817_v45 = vld [vmem:[%s2506_s1 + $0x130] sm:$0xff]  ;;  %s191_s26 = sand.u32 1, %s1785_s13  }
  0x1b   : > { %s1885_s30 = scalar_lea.vmem %s2505_s0, %s1223_s27  ;;  %1565 = vmatpush3.bf16.msra.mxu0 %v1562_v25  ;;  %1503 = vmatprep.subr.bf16.mxu1 %v1502_v31  ;;  %v1570_v41 = vpack.c.bf16 %v816_v40, %v815_v37  ;;  %v1510_v47 = vpack.c.bf16 %v576_v44, %v575_v43  ;;  %v818_v48 = vld [vmem:[%s2506_s1 + $0x138] sm:$0xff]  ;;  %v577_v50 = vld [vmem:[%s2506_s1 + $0xc0] sm:$0xff]  ;;  %v578_v51 = vld [vmem:[%s2506_s1 + $0xc8] sm:$0xff]  ;;  %s1212_s27 = sshll.u32 %s191_s26, 6 }
  0x1c   : > { %v1888_v0 = vld [vmem:[%s1885_s30 + $0x10] sm:$0xff]  ;;  %v1891_v1 = vld [vmem:[%s1885_s30] sm:$0xff]  ;;  %v1896_v2 = vld [vmem:[%s1885_s30 + $0x18] sm:$0xff]  ;;  %1567 = vmatprep.subr.bf16.mxu0 %v1566_v33  ;;  %v1574_v49 = vpack.c.bf16 %v818_v48, %v817_v45  ;;  %v1514_v55 = vpack.c.bf16 %v578_v51, %v577_v50  ;;  %s2438_s4 = scalar_lea.vmem [#allocation2], %s1212_s27  ;;  %s2459_s15 = scalar_lea.sflag [#allocation3], %s191_s26 }
  0x1d   : > { %243 = vadd.xlane.f32.xlu1 %v1888_v0  ;;  %241 = vadd.xlane.f32.xlu0 %v1891_v1  ;;  %v1899_v3 = vld [vmem:[%s1885_s30 + $0x8] sm:$0xff]  ;;  %v265_v5 = vmul.f32 %v1891_v1, %v1891_v1  ;;  %v266_v6 = vmul.f32 %v1888_v0, %v1888_v0  ;;  %v1910_v7 = vld [vmem:[%s1885_s30 + $0x40] sm:$0xff]  ;;  %v322_v8 = vmul.f32 %v1896_v2, %v1896_v2  ;;  %v1916_v9 = vld [vmem:[%s1885_s30 + $0x50] sm:$0xff]  ;;  %s1125_s6 = sshll.u32 %s2438_s4, 4  ;;  %s1729_s18 = scalar_lea.vmem %s1728_s11, 2048  ;;  %s2453_s6 = int_to_ptr.vmem [resolvable:$true] %s1125_s6 }
  0x1e   : > { %v321_v4 = vmul.f32 %v1899_v3, %v1899_v3  ;;  %v377_v10 = vmul.f32 %v1910_v7, %v1910_v7  ;;  %v1922_v11 = vld [vmem:[%s1885_s30 + $0x48] sm:$0xff]  ;;  %v378_v12 = vmul.f32 %v1916_v9, %v1916_v9  ;;  %v1928_v13 = vld [vmem:[%s1885_s30 + $0x58] sm:$0xff]  ;;  %v1939_v17 = vld [vmem:[%s1885_s30 + $0x20] sm:$0xff]  ;;  %1505 = vmatpush3.bf16.msra.mxu1 %v1502_v31  ;;  %s1723_s9 = scalar_lea.vmem %s2453_s6, 1024  ;;  %p1730_p1 = scmp.lt.s32.totalorder %s2453_s6, %s1728_s11 }
  0x1f   : > { %v434_v14 = vmul.f32 %v1928_v13, %v1928_v13  ;;  %v433_v15 = vmul.f32 %v1922_v11, %v1922_v11  ;;  %v1936_v16 = vld [vmem:[%s1885_s30 + $0x28] sm:$0xff]  ;;  %v1956_v23 = vld [vmem:[%s1885_s30 + $0x38] sm:$0xff]  ;;  %v1959_v24 = vld [vmem:[%s1885_s30 + $0x30] sm:$0xff]  ;;  %v267_v30 = vmul.f32 %v1939_v17, %v1939_v17  ;;  %1569 = vmatpush3.bf16.msra.mxu0 %v1566_v33  ;;  %1507 = vmatprep.subr.bf16.mxu1 %v1506_v39  ;;  %p1724_p12 = scmp.ne.s32.totalorder %s2453_s6, %s1723_s9  ;;  %p1731_p2 = scmp.lt.s32.totalorder %s1729_s18, %s1723_s9 }
  0x20   : > { %v323_v29 = vmul.f32 %v1936_v16, %v1936_v16  ;;  %v268_v34 = vmul.f32 %v1959_v24, %v1959_v24  ;;  %v1991_v38 = vld [vmem:[%s1885_s30 + $0x60] sm:$0xff]  ;;  %v324_v42 = vmul.f32 %v1956_v23, %v1956_v23  ;;  %v2009_v46 = vld [vmem:[%s1885_s30 + $0x70] sm:$0xff]  ;;  %1571 = vmatprep.subr.bf16.mxu0 %v1570_v41  ;;  %v2025_v53 = vld [vmem:[%s1885_s30 + $0x88] sm:$0xff] }
  0x21   : > { %299 = vadd.xlane.f32.xlu1 %v1896_v2  ;;  %297 = vadd.xlane.f32.xlu0 %v1899_v3  ;;  %v819_v52 = vld [vmem:[%s2506_s1 + $0x140] sm:$0xff]  ;;  %v820_v56 = vld [vmem:[%s2506_s1 + $0x148] sm:$0xff]  ;;  %v379_v58 = vmul.f32 %v1991_v38, %v1991_v38  ;;  %v579_v59 = vld [vmem:[%s2506_s1 + $0xd0] sm:$0xff]  ;;  %v380_v20 = vmul.f32 %v2009_v46, %v2009_v46  ;;  %p1725_p13 = pnand %p1724_p12, %p1866_p4  ;;  %p1732_p3 = por %p1731_p2, %p1730_p1 }
  0x22   : > { %1509 = vmatpush3.bf16.msra.mxu1 %v1506_v39  ;;  %v2028_v54 = vld [vmem:[%s1885_s30 + $0x80] sm:$0xff]  ;;  %v1578_v57 = vpack.c.bf16 %v820_v56, %v819_v52  ;;  %v580_v60 = vld [vmem:[%s2506_s1 + $0xd8] sm:$0xff]  ;;  %v821_v61 = vld [vmem:[%s2506_s1 + $0x150] sm:$0xff] }
  0x23   : > { %1573 = vmatpush3.bf16.msra.mxu0 %v1570_v41  ;;  %1511 = vmatprep.subr.bf16.mxu1 %v1510_v47  ;;  %v2047_v62 = vld [vmem:[%s1885_s30 + $0x68] sm:$0xff]  ;;  %v1518_v63 = vpack.c.bf16 %v580_v60, %v579_v59  ;;  %v583_v21 = vld [vmem:[%s2506_s1 + $0xf0] sm:$0xff]  ;;  %v584_v22 = vld [vmem:[%s2506_s1 + $0xf8] sm:$0xff]  ;;  %v269_v31 = vmul.f32 %v2028_v54, %v2028_v54  ;;  %p1726_p0 = pneg %p1725_p13 }
  0x24   : > { %1575 = vmatprep.subr.bf16.mxu0 %v1574_v49  ;;  %v824_v18 = vld [vmem:[%s2506_s1 + $0x168] sm:$0xff]  ;;  %v825_v25 = vld [vmem:[%s2506_s1 + $0x170] sm:$0xff]  ;;  %v2085_v26 = vld [vmem:[%s1885_s30 + $0x78] sm:$0xff]  ;;  %v1526_v27 = vpack.c.bf16 %v584_v22, %v583_v21  ;;  %v435_v32 = vmul.f32 %v2047_v62, %v2047_v62 }
  0x25   : > { %329 = vadd.xlane.f32.xlu1 %v321_v4  ;;  %273 = vadd.xlane.f32.xlu0 %v265_v5  ;;  %v822_v4 = vld [vmem:[%s2506_s1 + $0x158] sm:$0xff]  ;;  %v2098_v33 = vld [vmem:[%s1885_s30 + $0xc0] sm:$0xff]  ;;  %v436_v36 = vmul.f32 %v2085_v26, %v2085_v26  ;;  %v2108_v37 = vld [vmem:[%s1885_s30 + $0xd0] sm:$0xff]  ;;  %p1733_p5 = pnand %p1732_p3, %p1726_p0 }
  0x26   : > { %1513 = vmatpush3.bf16.msra.mxu1 %v1510_v47  ;;  %v1582_v5 = vpack.c.bf16 %v822_v4, %v821_v61  ;;  %v826_v28 = vld [vmem:[%s2506_s1 + $0x178] sm:$0xff]  ;;  %v2112_v39 = vld [vmem:[%s1885_s30 + $0xa8] sm:$0xff]  ;;  %v2115_v40 = vld [vmem:[%s1885_s30 + $0xa0] sm:$0xff]  ;;  %v381_v41 = vmul.f32 %v2098_v33, %v2098_v33  ;;  %v382_v45 = vmul.f32 %v2108_v37, %v2108_v37 }
  0x27   : > { %1577 = vmatpush3.bf16.msra.mxu0 %v1574_v49  ;;  %1515 = vmatprep.subr.bf16.mxu1 %v1514_v55  ;;  %v2126_v43 = vld [vmem:[%s1885_s30 + $0xb8] sm:$0xff]  ;;  %v2129_v44 = vld [vmem:[%s1885_s30 + $0xb0] sm:$0xff]  ;;  %v327_v48 = vmul.f32 %v2112_v39, %v2112_v39  ;;  %v271_v49 = vmul.f32 %v2115_v40, %v2115_v40  ;;  %v2146_v51 = vld [vmem:[%s1885_s30 + $0xe0] sm:$0xff] }
  0x28   : > { %1579 = vmatprep.subr.bf16.mxu0 %v1578_v57  ;;  %v2136_v47 = vld [vmem:[%s1885_s30 + $0xd8] sm:$0xff]  ;;  %v328_v52 = vmul.f32 %v2126_v43, %v2126_v43  ;;  %v2162_v59 = vld [vmem:[%s1885_s30 + $0xe8] sm:$0xff] }
  0x29   : > { %275 = vadd.xlane.f32.xlu1 %v266_v6  ;;  %353 = vadd.xlane.f32.xlu0 %v1910_v7  ;;  %v581_v6 = vld [vmem:[%s2506_s1 + $0xe0] sm:$0xff]  ;;  %v438_v56 = vmul.f32 %v2136_v47, %v2136_v47  ;;  %v2168_v61 = vld [vmem:[%s1885_s30 + $0xf8] sm:$0xff]  ;;  %v439_v4 = vmul.f32 %v2162_v59, %v2162_v59 }
  0x2a   : > { %1517 = vmatpush3.bf16.msra.mxu1 %v1514_v55  ;;  %v272_v55 = vmul.f32 %v2129_v44, %v2129_v44  ;;  %2512 = vst [vmem:[#allocation5_spill] sm:$0xff] %v2168_v61 }
  0x2b   : > { %1581 = vmatpush3.bf16.msra.mxu0 %v1578_v57  ;;  %1519 = vmatprep.subr.bf16.mxu1 %v1518_v63  ;;  %v2156_v57 = vld [vmem:[%s1885_s30 + $0xf0] sm:$0xff] }
  0x2c   : > { %1583 = vmatprep.subr.bf16.mxu0 %v1582_v5  ;;  %v384_v60 = vmul.f32 %v2156_v57, %v2156_v57 }
  0x2d   : > { %355 = vadd.xlane.f32.xlu1 %v1916_v9  ;;  %331 = vadd.xlane.f32.xlu0 %v322_v8  ;;  %v582_v8 = vld [vmem:[%s2506_s1 + $0xe8] sm:$0xff] }
  0x2e   : > { %1521 = vmatpush3.bf16.msra.mxu1 %v1518_v63  ;;  %v440_v63 = vmul.f32 %v2168_v61, %v2168_v61 }
  0x2f   : > { %1585 = vmatpush3.bf16.msra.mxu0 %v1582_v5  ;;  %v537_v5 = vld [vmem:[%s2506_s1] sm:$0xff] }
  0x31   : > { %409 = vadd.xlane.f32.xlu1 %v1922_v11  ;;  %385 = vadd.xlane.f32.xlu0 %v377_v10  ;;  %v823_v10 = vld [vmem:[%s2506_s1 + $0x160] sm:$0xff] }
  0x32   : > { %v1586_v19 = vpack.c.bf16 %v824_v18, %v823_v10 }
  0x34   : > { %1587 = vmatprep.subr.bf16.mxu0 %v1586_v19 }
  0x35   : > { %411 = vadd.xlane.f32.xlu1 %v1928_v13  ;;  %387 = vadd.xlane.f32.xlu0 %v378_v12  ;;  %v2063_v12 = vld [vmem:[%s1885_s30 + $0x98] sm:$0xff] }
  0x36   : > { %1589 = vmatpush3.bf16.msra.mxu0 %v1586_v19 }
  0x39   : > { %443 = vadd.xlane.f32.xlu1 %v434_v14  ;;  %441 = vadd.xlane.f32.xlu0 %v433_v15  ;;  %v2066_v14 = vld [vmem:[%s1885_s30 + $0x90] sm:$0xff]  ;;  %v1522_v15 = vpack.c.bf16 %v582_v8, %v581_v6  ;;  %v538_v6 = vld [vmem:[%s2506_s1 + $0x8] sm:$0xff]  ;;  %v956_v8 = vld [vmem:[%s2506_s1 + $0x180] sm:$0xff] }
  0x3a   : > { %v270_v35 = vmul.f32 %v2066_v14, %v2066_v14  ;;  %v2184_v10 = vpack.c.bf16 %v538_v6, %v537_v5 }
  0x3b   : > { %1523 = vmatprep.subr.bf16.mxu1 %v1522_v15 }
  0x3c   : > { %1525 = vmatpush3.bf16.msra.mxu1 %v1522_v15  ;;  %v957_v15 = vld [vmem:[%s2506_s1 + $0x188] sm:$0xff] }
  0x3d   : > { %301 = vadd.xlane.f32.xlu1 %v1936_v16  ;;  %245 = vadd.xlane.f32.xlu0 %v1939_v17  ;;  %v2189_v18 = vpack.c.bf16 %v957_v15, %v956_v8 }
  0x3e   : > { %1527 = vmatprep.subr.bf16.mxu1 %v1526_v27 }
  0x40   : > { %1529 = vmatpush3.bf16.msra.mxu1 %v1526_v27 }
  0x41   : > { %303 = vadd.xlane.f32.xlu1 %v1956_v23  ;;  %247 = vadd.xlane.f32.xlu0 %v1959_v24 }
  0x42   : > { %1531 = vmatprep.subr.bf16.mxu1 %v2184_v10 }
  0x45   : > { %333 = vadd.xlane.f32.xlu1 %v323_v29  ;;  %277 = vadd.xlane.f32.xlu0 %v267_v30  ;;  %v1590_v29 = vpack.c.bf16 %v826_v28, %v825_v25  ;;  %v325_v30 = vmul.f32 %v2025_v53, %v2025_v53 }
  0x47   : > { %1591 = vmatprep.subr.bf16.mxu0 %v1590_v29 }
  0x48   : > { %1593 = vmatpush3.bf16.msra.mxu0 %v1590_v29 }
  0x49   : > { %279 = vadd.xlane.f32.xlu1 %v268_v34  ;;  %357 = vadd.xlane.f32.xlu0 %v1991_v38  ;;  %v326_v34 = vmul.f32 %v2063_v12, %v2063_v12 }
  0x4a   : > { %1595 = vmatprep.subr.bf16.mxu0 %v2189_v18 }
  0x4d   : > { %359 = vadd.xlane.f32.xlu1 %v2009_v46  ;;  %335 = vadd.xlane.f32.xlu0 %v324_v42  ;;  %v2122_v42 = vld [vmem:[%s1885_s30 + $0xc8] sm:$0xff] }
  0x4e   : > { %v437_v50 = vmul.f32 %v2122_v42, %v2122_v42 }
  0x51   : > { %305 = vadd.xlane.f32.xlu1 %v2025_v53  ;;  %249 = vadd.xlane.f32.xlu0 %v2028_v54 }
  0x55   : > { %413 = vadd.xlane.f32.xlu1 %v2047_v62  ;;  %389 = vadd.xlane.f32.xlu0 %v379_v58  ;;  %v383_v58 = vmul.f32 %v2146_v51, %v2146_v51 }
  0x59   : > { %307 = vadd.xlane.f32.xlu1 %v2063_v12  ;;  %251 = vadd.xlane.f32.xlu0 %v2066_v14 }
  0x5d   : > { %415 = vadd.xlane.f32.xlu1 %v2085_v26  ;;  %391 = vadd.xlane.f32.xlu0 %v380_v20 }
  0x61   : > { %337 = vadd.xlane.f32.xlu1 %v325_v30  ;;  %281 = vadd.xlane.f32.xlu0 %v269_v31 }
  0x65   : > { %445 = vadd.xlane.f32.xlu1 %v435_v32  ;;  %361 = vadd.xlane.f32.xlu0 %v2098_v33 }
  0x69   : > { %339 = vadd.xlane.f32.xlu1 %v326_v34  ;;  %283 = vadd.xlane.f32.xlu0 %v270_v35 }
  0x6d   : > { %447 = vadd.xlane.f32.xlu1 %v436_v36  ;;  %363 = vadd.xlane.f32.xlu0 %v2108_v37 }
  0x71   : > { %309 = vadd.xlane.f32.xlu1 %v2112_v39  ;;  %253 = vadd.xlane.f32.xlu0 %v2115_v40 }
  0x75   : > { %417 = vadd.xlane.f32.xlu1 %v2122_v42  ;;  %393 = vadd.xlane.f32.xlu0 %v381_v41 }
  0x79   : > { %311 = vadd.xlane.f32.xlu1 %v2126_v43  ;;  %255 = vadd.xlane.f32.xlu0 %v2129_v44 }
  0x7d   : > { %419 = vadd.xlane.f32.xlu1 %v2136_v47  ;;  %395 = vadd.xlane.f32.xlu0 %v382_v45 }
  0x81   : > { %341 = vadd.xlane.f32.xlu1 %v327_v48  ;;  %285 = vadd.xlane.f32.xlu0 %v271_v49 }
  0x85   : > { %449 = vadd.xlane.f32.xlu1 %v437_v50  ;;  %365 = vadd.xlane.f32.xlu0 %v2146_v51 }
  0x89   : > { %343 = vadd.xlane.f32.xlu1 %v328_v52  ;;  %287 = vadd.xlane.f32.xlu0 %v272_v55 }
  0x8d   : > { %451 = vadd.xlane.f32.xlu1 %v438_v56  ;;  %367 = vadd.xlane.f32.xlu0 %v2156_v57 }
  0x91   : > { %421 = vadd.xlane.f32.xlu1 %v2162_v59  ;;  %397 = vadd.xlane.f32.xlu0 %v383_v58 }
  0x95   : > { %423 = vadd.xlane.f32.xlu1 %v2168_v61  ;;  %399 = vadd.xlane.f32.xlu0 %v384_v60 }
  0x99   : > { %455 = vadd.xlane.f32.xlu1 %v440_v63  ;;  %453 = vadd.xlane.f32.xlu0 %v439_v4 }
  0xaa   : > { %v244_v19 = vpop.xlane.xlu1 %243  ;;  %v242_v20 = vpop.xlane.xlu0 %241 }
  0xae   : > { %v300_v21 = vpop.xlane.xlu1 %299  ;;  %v298_v22 = vpop.xlane.xlu0 %297 }
  0xaf   : > { %v313_v32 = vadd.f32 %v298_v22, %v242_v20  ;;  %v314_v36 = vadd.f32 %v300_v21, %v244_v19 }
  0xb2   : > { %v330_v25 = vpop.xlane.xlu1 %329  ;;  %v274_v27 = vpop.xlane.xlu0 %273 }
  0xb3   : > { %v345_v56 = vadd.f32 %v330_v25, %v274_v27 }
  0xb6   : > { %v276_v28 = vpop.xlane.xlu1 %275  ;;  %v354_v29 = vpop.xlane.xlu0 %353 }
  0xb7   : > { %v369_v41 = vadd.f32 %v354_v29, %v313_v32 }
  0xba   : > { %v356_v30 = vpop.xlane.xlu1 %355  ;;  %v332_v31 = vpop.xlane.xlu0 %331 }
  0xbb   : > { %v370_v45 = vadd.f32 %v356_v30, %v314_v36  ;;  %v346_v52 = vadd.f32 %v332_v31, %v276_v28 }
  0xbe   : > { %v410_v34 = vpop.xlane.xlu1 %409  ;;  %v386_v35 = vpop.xlane.xlu0 %385 }
  0xbf   : > { %v425_v48 = vadd.f32 %v410_v34, %v369_v41  ;;  %v401_v4 = vadd.f32 %v386_v35, %v345_v56 }
  0xc1   : > { %v465_v63 = vmul.f32 0.001953125, %v425_v48 }
  0xc2   : > { %v412_v49 = vpop.xlane.xlu1 %411  ;;  %v388_v50 = vpop.xlane.xlu0 %387 }
  0xc3   : > { %v426_v55 = vadd.f32 %v412_v49, %v370_v45  ;;  %v402_v60 = vadd.f32 %v388_v50, %v346_v52  ;;  %v481_v61 = vmul.f32 %v465_v63, %v465_v63 }
  0xc5   : > { %v466_v58 = vmul.f32 0.001953125, %v426_v55 }
  0xc6   : > { %v444_v5 = vpop.xlane.xlu1 %443  ;;  %v442_v6 = vpop.xlane.xlu0 %441 }
  0xc7   : > { %v458_v8 = vadd.f32 %v444_v5, %v402_v60  ;;  %v457_v15 = vadd.f32 %v442_v6, %v401_v4  ;;  %v482_v20 = vmul.f32 %v466_v58, %v466_v58  ;;  %v941_v49 = vsub.f32 %v1928_v13, %v466_v58  ;;  %v539_v60 = vld [vmem:[%s2506_s1 + $0x10] sm:$0xff] }
  0xc8   : > { %v554_v55 = vsub.f32 %v1896_v2, %v466_v58  ;;  %v796_v56 = vsub.f32 %v1916_v9, %v466_v58  ;;  %v553_v5 = vsub.f32 %v1899_v3, %v465_v63  ;;  %v795_v6 = vsub.f32 %v1910_v7, %v465_v63  ;;  %v958_v13 = vld [vmem:[%s2506_s1 + $0x190] sm:$0xff]  ;;  %v959_v2 = vld [vmem:[%s2506_s1 + $0x198] sm:$0xff] }
  0xc9   : > { %v474_v22 = vmul.f32 0.001953125, %v458_v8  ;;  %v473_v19 = vmul.f32 0.001953125, %v457_v15  ;;  %v521_v9 = vsub.f32 %v1891_v1, %v465_v63 }
  0xca   : > { %v2193_v21 = vpop.xlane.xlu1 %301  ;;  %v2195_v29 = vpop.xlane.xlu0 %245 }
  0xcb   : > { %v490_v30 = vsub.f32 %v474_v22, %v482_v20  ;;  %v489_v28 = vsub.f32 %v473_v19, %v481_v61  ;;  %v522_v61 = vsub.f32 %v1888_v0, %v466_v58  ;;  %v540_v0 = vld [vmem:[%s2506_s1 + $0x18] sm:$0xff]  ;;  %v940_v58 = vsub.f32 %v1922_v11, %v465_v63  ;;  %v541_v11 = vld [vmem:[%s2506_s1 + $0x20] sm:$0xff]  ;;  %v542_v63 = vld [vmem:[%s2506_s1 + $0x28] sm:$0xff] }
  0xcc   : > { %v1534_v1 = vpack.c.bf16 %v540_v0, %v539_v60 }
  0xcd   : > { %v498_v31 = vmax.f32 %v490_v30, 0.0  ;;  %v497_v25 = vmax.f32 %v489_v28, 0.0 }
  0xce   : > { %v2197_v27 = vpop.xlane.xlu1 %303  ;;  %v2199_v32 = vpop.xlane.xlu0 %247 }
  0xcf   : > { %v506_v34 = vadd.f32 1e-05, %v498_v31  ;;  %v505_v35 = vadd.f32 1e-05, %v497_v25 }
  0xd1   : > { %1707 = vrsqrt.f32 %v506_v34  ;;  %v1598_v34 = vpack.c.bf16 %v959_v2, %v958_v13 }
  0xd2   : > { %1709 = vrsqrt.f32 %v505_v35  ;;  %v2201_v36 = vpop.xlane.xlu1 %333  ;;  %v2203_v41 = vpop.xlane.xlu0 %277  ;;  %v960_v35 = vld [vmem:[%s2506_s1 + $0x1a0] sm:$0xff] }
  0xd6   : > { %v2205_v45 = vpop.xlane.xlu1 %279  ;;  %v2207_v48 = vpop.xlane.xlu0 %357 }
  0xda   : > { %v2211_v50 = vpop.xlane.xlu1 %359  ;;  %v2213_v52 = vpop.xlane.xlu0 %335 }
  0xdb   : > { %v1708_v4 = vpop.eup %1707 }
  0xdc   : > { %v1710_v8 = vpop.eup %1709  ;;  %v562_v3 = vmul.f32 %v1708_v4, %v554_v55  ;;  %v804_v15 = vmul.f32 %v1708_v4, %v796_v56  ;;  %v2233_v7 = vmul.f32 %v1708_v4, %v522_v61  ;;  %v2235_v20 = vmul.f32 %v1708_v4, %v941_v49  ;;  %v961_v61 = vld [vmem:[%s2506_s1 + $0x1a8] sm:$0xff]  ;;  %v543_v4 = vld [vmem:[%s2506_s1 + $0x30] sm:$0xff] }
  0xdd   : > { %v561_v22 = vmul.f32 %v1710_v8, %v553_v5  ;;  %v803_v19 = vmul.f32 %v1710_v8, %v795_v6  ;;  %v2237_v30 = vmul.f32 %v1710_v8, %v521_v9  ;;  %v2239_v28 = vmul.f32 %v1710_v8, %v940_v58  ;;  %v544_v5 = vld [vmem:[%s2506_s1 + $0x38] sm:$0xff]  ;;  %v545_v9 = vld [vmem:[%s2506_s1 + $0x40] sm:$0xff]  ;;  %v546_v58 = vld [vmem:[%s2506_s1 + $0x48] sm:$0xff] }
  0xde   : > { %v2241_v31 = vpop.xlane.xlu1 %305  ;;  %v2243_v25 = vpop.xlane.xlu0 %249  ;;  %v1538_v56 = vpack.c.bf16 %v542_v63, %v541_v11  ;;  %v1602_v60 = vpack.c.bf16 %v961_v61, %v960_v35  ;;  %v1542_v13 = vpack.c.bf16 %v544_v5, %v543_v4  ;;  %v964_v8 = vld [vmem:[%s2506_s1 + $0x1c0] sm:$0xff]  ;;  %v547_v11 = vld [vmem:[%s2506_s1 + $0x50] sm:$0xff]  ;;  %v548_v35 = vld [vmem:[%s2506_s1 + $0x58] sm:$0xff] }
  0xdf   : > { %1354 = vmatprep.mubr.f32.mxu1 %v561_v22  ;;  %1442 = vmatprep.mubr.f32.mxu0 %v803_v19  ;;  %v549_v5 = vld [vmem:[%s2506_s1 + $0x60] sm:$0xff] }
  0xe0   : > { %1355 = vmatmul.mubr.f32.vlgmr.msra.gmra.mrb[0].mxu1 %v562_v3  ;;  %1443 = vmatmul.mubr.f32.vlgmr.msra.gmra.mrb[0].mxu0 %v804_v15  ;;  %v965_v3 = vld [vmem:[%s2506_s1 + $0x1c8] sm:$0xff]  ;;  %v315_v15 = vadd.f32 %v2193_v21, %v2195_v29  ;;  %v966_v21 = vld [vmem:[%s2506_s1 + $0x1d0] sm:$0xff]  ;;  %v967_v29 = vld [vmem:[%s2506_s1 + $0x1d8] sm:$0xff] }
  0xe1   : > { %1533 = vmatpush3.bf16.msra.mxu1 %v2184_v10  ;;  %1597 = vmatpush3.bf16.msra.mxu0 %v2189_v18  ;;  %v962_v10 = vld [vmem:[%s2506_s1 + $0x1b0] sm:$0xff]  ;;  %v963_v18 = vld [vmem:[%s2506_s1 + $0x1b8] sm:$0xff]  ;;  %v1614_v4 = vpack.c.bf16 %v967_v29, %v966_v21 }
  0xe2   : > { %v414_v49 = vpop.xlane.xlu1 %413  ;;  %v390_v55 = vpop.xlane.xlu0 %389  ;;  %1535 = vmatprep.subr.bf16.mxu1 %v1534_v1  ;;  %1599 = vmatprep.subr.bf16.mxu0 %v1598_v34  ;;  %v1606_v2 = vpack.c.bf16 %v963_v18, %v962_v10  ;;  %v371_v63 = vadd.f32 %v2207_v48, %v315_v15  ;;  %v1550_v48 = vpack.c.bf16 %v548_v35, %v547_v11  ;;  %v968_v18 = vld [vmem:[%s2506_s1 + $0x1e0] sm:$0xff]  ;;  %v551_v15 = vld [vmem:[%s2506_s1 + $0x70] sm:$0xff] }
  0xe3   : > { %v347_v10 = vadd.f32 %v2201_v36, %v2203_v41 }
  0xe4   : > { %v427_v61 = vadd.f32 %v414_v49, %v371_v63  ;;  %v550_v49 = vld [vmem:[%s2506_s1 + $0x68] sm:$0xff] }
  0xe5   : > { %1537 = vmatpush3.bf16.msra.mxu1 %v1534_v1  ;;  %1601 = vmatpush3.bf16.msra.mxu0 %v1598_v34  ;;  %v1546_v1 = vpack.c.bf16 %v546_v58, %v545_v9  ;;  %v1610_v34 = vpack.c.bf16 %v965_v3, %v964_v8  ;;  %v403_v58 = vadd.f32 %v390_v55, %v347_v10  ;;  %v971_v55 = vld [vmem:[%s2506_s1 + $0x1f8] sm:$0xff] }
  0xe6   : > { %v2271_v6 = vpop.xlane.xlu1 %307  ;;  %v2273_v0 = vpop.xlane.xlu0 %251  ;;  %1539 = vmatprep.subr.bf16.mxu1 %v1538_v56  ;;  %1603 = vmatprep.subr.bf16.mxu0 %v1602_v60  ;;  %v2322_v9 = vmul.f32 0.001953125, %v427_v61  ;;  %v1554_v8 = vpack.c.bf16 %v550_v49, %v549_v5  ;;  %v348_v5 = vadd.f32 %v2213_v52, %v2205_v45 }
  0xe8   : > { %v483_v35 = vmul.f32 %v2322_v9, %v2322_v9 }
  0xe9   : > { %1541 = vmatpush3.bf16.msra.mxu1 %v1538_v56  ;;  %1605 = vmatpush3.bf16.msra.mxu0 %v1602_v60 }
  0xea   : > { %v416_v22 = vpop.xlane.xlu1 %415  ;;  %v392_v19 = vpop.xlane.xlu0 %391  ;;  %1543 = vmatprep.subr.bf16.mxu1 %v1542_v13  ;;  %1607 = vmatprep.subr.bf16.mxu0 %v1606_v2 }
  0xed   : > { %1545 = vmatpush3.bf16.msra.mxu1 %v1542_v13  ;;  %1609 = vmatpush3.bf16.msra.mxu0 %v1606_v2  ;;  %v969_v13 = vld [vmem:[%s2506_s1 + $0x1e8] sm:$0xff]  ;;  %v316_v2 = vadd.f32 %v2197_v27, %v2199_v32  ;;  %v552_v27 = vld [vmem:[%s2506_s1 + $0x78] sm:$0xff]  ;;  %v970_v32 = vld [vmem:[%s2506_s1 + $0x1f0] sm:$0xff] }
  0xee   : > { %v2302_v56 = vpop.xlane.xlu1 %337  ;;  %v2304_v60 = vpop.xlane.xlu0 %281  ;;  %1547 = vmatprep.subr.bf16.mxu1 %v1546_v1  ;;  %1611 = vmatprep.subr.bf16.mxu0 %v1610_v34  ;;  %v1618_v3 = vpack.c.bf16 %v969_v13, %v968_v18  ;;  %v1558_v29 = vpack.c.bf16 %v552_v27, %v551_v15  ;;  %v1622_v61 = vpack.c.bf16 %v971_v55, %v970_v32 }
  0xef   : > { %v372_v11 = vadd.f32 %v2211_v50, %v316_v2  ;;  %v555_v32 = vsub.f32 %v1936_v16, %v2322_v9  ;;  %v797_v55 = vsub.f32 %v1991_v38, %v2322_v9 }
  0xf1   : > { %1549 = vmatpush3.bf16.msra.mxu1 %v1546_v1  ;;  %1613 = vmatpush3.bf16.msra.mxu0 %v1610_v34  ;;  %v428_v1 = vadd.f32 %v416_v22, %v372_v11  ;;  %v404_v22 = vadd.f32 %v392_v19, %v348_v5 }
  0xf2   : > { %v446_v36 = vpop.xlane.xlu1 %445  ;;  %v2324_v41 = vpop.xlane.xlu0 %361  ;;  %1551 = vmatprep.subr.bf16.mxu1 %v1550_v48  ;;  %1615 = vmatprep.subr.bf16.mxu0 %v1614_v4 }
  0xf3   : > { %v459_v63 = vadd.f32 %v446_v36, %v403_v58  ;;  %v468_v49 = vmul.f32 0.001953125, %v428_v1  ;;  %v523_v1 = vsub.f32 %v1939_v17, %v2322_v9 }
  0xf5   : > { %v475_v34 = vmul.f32 0.001953125, %v459_v63  ;;  %1553 = vmatpush3.bf16.msra.mxu1 %v1550_v48  ;;  %1617 = vmatpush3.bf16.msra.mxu0 %v1614_v4  ;;  %v484_v36 = vmul.f32 %v468_v49, %v468_v49 }
  0xf6   : > { %v2341_v50 = vpop.xlane.xlu1 %339  ;;  %v2343_v21 = vpop.xlane.xlu0 %283  ;;  %1555 = vmatprep.subr.bf16.mxu1 %v1554_v8  ;;  %1619 = vmatprep.subr.bf16.mxu0 %v1618_v3 }
  0xf7   : > { %v491_v10 = vsub.f32 %v475_v34, %v483_v35  ;;  %v942_v34 = vsub.f32 %v2047_v62, %v2322_v9  ;;  %v556_v62 = vsub.f32 %v1956_v23, %v468_v49  ;;  %v798_v9 = vsub.f32 %v2009_v46, %v468_v49 }
  0xf9   : > { %v499_v18 = vmax.f32 %v491_v10, 0.0  ;;  %1557 = vmatpush3.bf16.msra.mxu1 %v1554_v8  ;;  %1621 = vmatpush3.bf16.msra.mxu0 %v1618_v3 }
  0xfa   : > { %v448_v13 = vpop.xlane.xlu1 %447  ;;  %v364_v48 = vpop.xlane.xlu0 %363  ;;  %1559 = vmatprep.subr.bf16.mxu1 %v1558_v29  ;;  %1623 = vmatprep.subr.bf16.mxu0 %v1622_v61 }
  0xfb   : > { %v507_v4 = vadd.f32 1e-05, %v499_v18  ;;  %v460_v2 = vadd.f32 %v448_v13, %v404_v22  ;;  %v317_v22 = vadd.f32 %v2241_v31, %v2243_v25  ;;  %v349_v31 = vadd.f32 %v2302_v56, %v2304_v60 }
  0xfd   : > { %1711 = vrsqrt.f32 %v507_v4  ;;  %v476_v58 = vmul.f32 0.001953125, %v460_v2  ;;  %1561 = vmatpush3.bf16.msra.mxu1 %v1558_v29  ;;  %1625 = vmatpush3.bf16.msra.mxu0 %v1622_v61  ;;  %v373_v18 = vadd.f32 %v2324_v41, %v317_v22  ;;  %v524_v2 = vsub.f32 %v1959_v24, %v468_v49 }
  0xfe   : > { %v310_v15 = vpop.xlane.xlu1 %309  ;;  %v254_v11 = vpop.xlane.xlu0 %253 }
  0xff   : > { %v492_v45 = vsub.f32 %v476_v58, %v484_v36  ;;  %v943_v58 = vsub.f32 %v2085_v26, %v468_v49 }
 0x101   : > { %v500_v52 = vmax.f32 %v492_v45, 0.0 }
 0x102   : > { %v418_v63 = vpop.xlane.xlu1 %417  ;;  %v394_v19 = vpop.xlane.xlu0 %393 }
 0x103   : > { %v508_v27 = vadd.f32 1e-05, %v500_v52  ;;  %v429_v17 = vadd.f32 %v418_v63, %v373_v18  ;;  %v318_v63 = vadd.f32 %v2271_v6, %v2273_v0  ;;  %v405_v46 = vadd.f32 %v394_v19, %v349_v31 }
 0x104   : > { %v319_v18 = vadd.f32 %v310_v15, %v254_v11 }
 0x105   : > { %1713 = vrsqrt.f32 %v508_v27  ;;  %v2374_v23 = vmul.f32 0.001953125, %v429_v17  ;;  %v374_v26 = vadd.f32 %v364_v48, %v318_v63 }
 0x106   : > { %v312_v8 = vpop.xlane.xlu1 %311  ;;  %v256_v3 = vpop.xlane.xlu0 %255 }
 0x107   : > { %v1712_v35 = vpop.eup %1711  ;;  %v485_v60 = vmul.f32 %v2374_v23, %v2374_v23 }
 0x108   : > { %v563_v29 = vmul.f32 %v1712_v35, %v555_v32  ;;  %v805_v61 = vmul.f32 %v1712_v35, %v797_v55  ;;  %v2355_v5 = vmul.f32 %v1712_v35, %v523_v1  ;;  %v2357_v10 = vmul.f32 %v1712_v35, %v942_v34 }
 0x109   : > { %v350_v34 = vadd.f32 %v2341_v50, %v2343_v21 }
 0x10a   : > { %v420_v16 = vpop.xlane.xlu1 %419  ;;  %1357 = vmatprep.mubr.f32.mxu1 %v563_v29  ;;  %1445 = vmatprep.mubr.f32.mxu0 %v805_v61  ;;  %v396_v38 = vpop.xlane.xlu0 %395 }
 0x10b   : > { %v430_v32 = vadd.f32 %v420_v16, %v374_v26  ;;  %v406_v19 = vadd.f32 %v396_v38, %v350_v34 }
 0x10d   : > { %v2380_v0 = vmul.f32 0.001953125, %v430_v32 }
 0x10e   : > { %v342_v13 = vpop.xlane.xlu1 %341  ;;  %v286_v4 = vpop.xlane.xlu0 %285 }
 0x10f   : > { %v1714_v36 = vpop.eup %1713  ;;  %v486_v17 = vmul.f32 %v2380_v0, %v2380_v0  ;;  %v351_v38 = vadd.f32 %v342_v13, %v286_v4  ;;  %v799_v13 = vsub.f32 %v2098_v33, %v2374_v23  ;;  %v558_v33 = vsub.f32 %v2063_v12, %v2380_v0 }
 0x110   : > { %v564_v25 = vmul.f32 %v1714_v36, %v556_v62  ;;  %v806_v45 = vmul.f32 %v1714_v36, %v798_v9  ;;  %v2368_v52 = vmul.f32 %v1714_v36, %v524_v2  ;;  %v2370_v41 = vmul.f32 %v1714_v36, %v943_v58 }
 0x111   : > { %v320_v2 = vadd.f32 %v312_v8, %v256_v3  ;;  %v557_v3 = vsub.f32 %v2025_v53, %v2374_v23 }
 0x112   : > { %v450_v27 = vpop.xlane.xlu1 %449  ;;  %1358 = vmatmul.mubr.f32.gmra.mrb[2].mxu1 %v564_v25  ;;  %1446 = vmatmul.mubr.f32.gmra.mrb[2].mxu0 %v806_v45  ;;  %v366_v24 = vpop.xlane.xlu0 %365 }
 0x113   : > { %v461_v49 = vadd.f32 %v450_v27, %v405_v46  ;;  %v375_v58 = vadd.f32 %v366_v24, %v319_v18 }
 0x115   : > { %v477_v56 = vmul.f32 0.001953125, %v461_v49 }
 0x116   : > { %v344_v55 = vpop.xlane.xlu1 %343  ;;  %v288_v1 = vpop.xlane.xlu0 %287 }
 0x117   : > { %v493_v6 = vsub.f32 %v477_v56, %v485_v60  ;;  %v352_v63 = vadd.f32 %v344_v55, %v288_v1 }
 0x119   : > { %v501_v35 = vmax.f32 %v493_v6, 0.0 }
 0x11a   : > { %v452_v29 = vpop.xlane.xlu1 %451  ;;  %v368_v61 = vpop.xlane.xlu0 %367 }
 0x11b   : > { %v509_v22 = vadd.f32 1e-05, %v501_v35  ;;  %v462_v48 = vadd.f32 %v452_v29, %v406_v19  ;;  %v376_v36 = vadd.f32 %v368_v61, %v320_v2 }
 0x11d   : > { %1715 = vrsqrt.f32 %v509_v22  ;;  %v478_v16 = vmul.f32 0.001953125, %v462_v48  ;;  %v800_v22 = vsub.f32 %v2108_v37, %v2380_v0 }
 0x11e   : > { %v422_v62 = vpop.xlane.xlu1 %421  ;;  %v398_v9 = vpop.xlane.xlu0 %397 }
 0x11f   : > { %v494_v50 = vsub.f32 %v478_v16, %v486_v17  ;;  %v431_v31 = vadd.f32 %v422_v62, %v375_v58  ;;  %v407_v15 = vadd.f32 %v398_v9, %v351_v38 }
 0x121   : > { %v502_v21 = vmax.f32 %v494_v50, 0.0  ;;  %v2384_v11 = vmul.f32 0.001953125, %v431_v31 }
 0x122   : > { %v424_v25 = vpop.xlane.xlu1 %423  ;;  %v400_v45 = vpop.xlane.xlu0 %399 }
 0x123   : > { %v510_v46 = vadd.f32 1e-05, %v502_v21  ;;  %v432_v27 = vadd.f32 %v424_v25, %v376_v36  ;;  %v408_v49 = vadd.f32 %v400_v45, %v352_v63  ;;  %v487_v6 = vmul.f32 %v2384_v11, %v2384_v11 }
 0x124   : > { %v559_v12 = vsub.f32 %v2112_v39, %v2384_v11  ;;  %v801_v37 = vsub.f32 %v2146_v51, %v2384_v11  ;;  %v525_v39 = vsub.f32 %v2028_v54, %v2374_v23  ;;  %v527_v54 = vsub.f32 %v2115_v40, %v2384_v11 }
 0x125   : > { %1717 = vrsqrt.f32 %v510_v46  ;;  %v2386_v26 = vmul.f32 0.001953125, %v432_v27 }
 0x126   : > { %v456_v32 = vpop.xlane.xlu1 %455  ;;  %v454_v8 = vpop.xlane.xlu0 %453 }
 0x127   : > { %v1716_v4 = vpop.eup %1715  ;;  %v464_v24 = vadd.f32 %v456_v32, %v408_v49  ;;  %v463_v56 = vadd.f32 %v454_v8, %v407_v15  ;;  %v488_v34 = vmul.f32 %v2386_v26, %v2386_v26  ;;  %v560_v9 = vsub.f32 %v2126_v43, %v2386_v26 }
 0x128   : > { %v565_v60 = vmul.f32 %v1716_v4, %v557_v3  ;;  %v807_v55 = vmul.f32 %v1716_v4, %v799_v13  ;;  %v802_v2 = vsub.f32 %v2156_v57, %v2386_v26  ;;  %v944_v43 = vsub.f32 %v2122_v42, %v2374_v23 }
 0x129   : > { %v480_v1 = vmul.f32 0.001953125, %v464_v24  ;;  %v479_v19 = vmul.f32 0.001953125, %v463_v56  ;;  %v533_v51 = vmul.f32 %v1716_v4, %v525_v39  ;;  %v946_v42 = vsub.f32 %v2162_v59, %v2384_v11 }
 0x12a   : > { %1360 = vmatprep.mubr.f32.mxu1 %v565_v60  ;;  %1448 = vmatprep.mubr.f32.mxu0 %v807_v55  ;;  %v952_v57 = vmul.f32 %v1716_v4, %v944_v43 }
 0x12b   : > { %v496_v35 = vsub.f32 %v480_v1, %v488_v34  ;;  %v495_v53 = vsub.f32 %v479_v19, %v487_v6 }
 0x12d   : > { %v504_v29 = vmax.f32 %v496_v35, 0.0  ;;  %v503_v61 = vmax.f32 %v495_v53, 0.0 }
 0x12f   : > { %v1718_v48 = vpop.eup %1717  ;;  %v512_v18 = vadd.f32 1e-05, %v504_v29  ;;  %v511_v16 = vadd.f32 1e-05, %v503_v61 }
 0x130   : > { %v566_v17 = vmul.f32 %v1718_v48, %v558_v33  ;;  %v808_v62 = vmul.f32 %v1718_v48, %v800_v22 }
 0x131   : > { %1719 = vrsqrt.f32 %v512_v18 }
 0x132   : > { %1721 = vrsqrt.f32 %v511_v16  ;;  %1361 = vmatmul.mubr.f32.gmra.mrb[4].mxu1 %v566_v17  ;;  %1449 = vmatmul.mubr.f32.gmra.mrb[4].mxu0 %v808_v62 }
 0x13b   : > { %v1720_v58 = vpop.eup %1719 }
 0x13c   : > { %v1722_v50 = vpop.eup %1721  ;;  %v568_v21 = vmul.f32 %v1720_v58, %v560_v9  ;;  %v810_v36 = vmul.f32 %v1720_v58, %v802_v2 }
 0x13d   : > { %v567_v31 = vmul.f32 %v1722_v50, %v559_v12  ;;  %v809_v38 = vmul.f32 %v1722_v50, %v801_v37 }
 0x13f   : > { %1363 = vmatprep.mubr.f32.mxu1 %v567_v31  ;;  %1451 = vmatprep.mubr.f32.mxu0 %v809_v38 }
 0x140   : > { %1364 = vmatmul.mubr.f32.gmra.mrb[6].mxu1 %v568_v21  ;;  %1452 = vmatmul.mubr.f32.gmra.mrb[6].mxu0 %v810_v36 }
 0x141   : > { %1398 = vmatprep.mubr.f32.mxu1 %v2237_v30  ;;  %1486 = vmatprep.mubr.f32.mxu0 %v2239_v28 }
 0x144   : > { %1399 = vmatmul.mubr.f32.vlgmr.msra.gmra.mrb[0].mxu1 %v2233_v7  ;;  %1487 = vmatmul.mubr.f32.vlgmr.msra.gmra.mrb[0].mxu0 %v2235_v20  ;;  %v526_v7 = vsub.f32 %v2066_v14, %v2380_v0  ;;  %v945_v20 = vsub.f32 %v2136_v47, %v2380_v0  ;;  %v528_v14 = vsub.f32 %v2129_v44, %v2386_v26  ;;  %v2513_v47 = vld [vmem:[#allocation5_spill] sm:$0xff] }
 0x145   : > { %1401 = vmatprep.mubr.f32.mxu1 %v2355_v5  ;;  %1489 = vmatprep.mubr.f32.mxu0 %v2357_v10  ;;  %v535_v5 = vmul.f32 %v1722_v50, %v527_v54  ;;  %v954_v10 = vmul.f32 %v1722_v50, %v946_v42  ;;  %v1216_v0 = vld [vmem:[%s2507_s2] ss:$0 sm:$0xff] }
 0x146   : > { %v534_v30 = vmul.f32 %v1718_v48, %v526_v7  ;;  %v953_v28 = vmul.f32 %v1718_v48, %v945_v20  ;;  %v536_v40 = vmul.f32 %v1720_v58, %v528_v14 }
 0x148   : > { %1402 = vmatmul.mubr.f32.gmra.mrb[2].mxu1 %v2368_v52  ;;  %1490 = vmatmul.mubr.f32.gmra.mrb[2].mxu0 %v2370_v41  ;;  %v947_v52 = vsub.f32 %v2513_v47, %v2386_v26 }
 0x149   : > { %1404 = vmatprep.mubr.f32.mxu1 %v533_v51  ;;  %1492 = vmatprep.mubr.f32.mxu0 %v952_v57 }
 0x14a   : > { %v955_v41 = vmul.f32 %v1720_v58, %v947_v52 }
 0x14c   : > { %1405 = vmatmul.mubr.f32.gmra.mrb[4].mxu1 %v534_v30  ;;  %1493 = vmatmul.mubr.f32.gmra.mrb[4].mxu0 %v953_v28 }
 0x14d   : > { %1407 = vmatprep.mubr.f32.mxu1 %v535_v5  ;;  %1495 = vmatprep.mubr.f32.mxu0 %v954_v10 }
 0x150   : > { %1408 = vmatmul.mubr.f32.gmra.mrb[6].mxu1 %v536_v40  ;;  %1496 = vmatmul.mubr.f32.gmra.mrb[6].mxu0 %v955_v41 }
 0x217   : > { %v1400_v59 = vpop.f32.mrb[0].mxu1  ;;  %v1488_v23 = vpop.f32.mrb[0].mxu0 }
 0x218   : > { %v1626_v25 = vadd.f32 %v1488_v23, %v1400_v59  ;;  %v756_v44 = vpop.f32.mrb[1].mxu1  ;;  %v1038_v45 = vpop.f32.mrb[1].mxu0 }
 0x219   : > { %v1627_v63 = vadd.f32 %v1038_v45, %v756_v44 }
 0x21a   : > { %v1093_v46 = vadd.f32 %v1626_v25, %v1216_v0 }
 0x21b   : > { %v1092_v27 = vadd.f32 %v1627_v63, %v1216_v0  ;;  %v1403_v15 = vpop.f32.mrb[2].mxu1  ;;  %v1491_v11 = vpop.f32.mrb[2].mxu0 }
 0x21c   : > { %1101 = vst [vmem:[%s2438_s4 + $0x8] sm:$0xff] %v1093_v46  ;;  %v1628_v26 = vadd.f32 %v1491_v11, %v1403_v15  ;;  %v766_v49 = vpop.f32.mrb[3].mxu1  ;;  %v1048_v32 = vpop.f32.mrb[3].mxu0 }
 0x21d   : > { %1100 = vst [vmem:[%s2438_s4] sm:$0xff] %v1092_v27  ;;  %v1629_v8 = vadd.f32 %v1048_v32, %v766_v49 }
 0x21e   : > { %v1095_v3 = vadd.f32 %v1628_v26, %v1216_v0 }
 0x21f   : > { %v1094_v13 = vadd.f32 %v1629_v8, %v1216_v0  ;;  %v1406_v4 = vpop.f32.mrb[4].mxu1  ;;  %v1494_v24 = vpop.f32.mrb[4].mxu0 }
 0x220   : > { %1103 = vst [vmem:[%s2438_s4 + $0x18] sm:$0xff] %v1095_v3  ;;  %v1630_v56 = vadd.f32 %v1494_v24, %v1406_v4  ;;  %v776_v60 = vpop.f32.mrb[5].mxu1  ;;  %v1058_v55 = vpop.f32.mrb[5].mxu0 }
 0x221   : > { %1102 = vst [vmem:[%s2438_s4 + $0x10] sm:$0xff] %v1094_v13  ;;  %v1631_v1 = vadd.f32 %v1058_v55, %v776_v60 }
 0x222   : > { %v1097_v34 = vadd.f32 %v1630_v56, %v1216_v0 }
 0x223   : > { %v1096_v6 = vadd.f32 %v1631_v1, %v1216_v0  ;;  %v1409_v19 = vpop.f32.mrb[6].mxu1  ;;  %v1497_v35 = vpop.f32.mrb[6].mxu0 }
 0x224   : > { %1105 = vst [vmem:[%s2438_s4 + $0x28] sm:$0xff] %v1097_v34  ;;  %v1632_v53 = vadd.f32 %v1497_v35, %v1409_v19  ;;  %v786_v29 = vpop.f32.mrb[7].mxu1  ;;  %v1068_v61 = vpop.f32.mrb[7].mxu0 }
 0x225   : > { %1104 = vst [vmem:[%s2438_s4 + $0x20] sm:$0xff] %v1096_v6  ;;  %v1633_v33 = vadd.f32 %v1068_v61, %v786_v29 }
 0x226   : > { %v1099_v22 = vadd.f32 %v1632_v53, %v1216_v0 }
 0x227   : > { %v1098_v48 = vadd.f32 %v1633_v33, %v1216_v0 }
 0x228   : > { %1107 = vst [vmem:[%s2438_s4 + $0x38] sm:$0xff] %v1099_v22 }
 0x229   : > { %1106 = vst [vmem:[%s2438_s4 + $0x30] sm:$0xff] %v1098_v48 }
 0x22a   : > { %1736 = shalt.err (!%p1733_p5)
}
 0x22b   : > { %s1737_s19 = scalar_lea.hbm %s2451_s8, 1024  ;;  %s1741_s26 = scalar_lea.hbm %s2508_s3, 2048 }
 0x22c   : > { %p1738_p6 = scmp.ne.s32.totalorder %s2451_s8, %s1737_s19  ;;  %p1742_p10 = scmp.lt.u32.totalorder %s2451_s8, %s2508_s3 }
 0x22d   : > { %p1743_p11 = scmp.lt.u32.totalorder %s1741_s26, %s1737_s19  ;;  %p1745_p13 = scmp.lt.u32.totalorder %s1737_s19, %s2451_s8 }
 0x22e   : > { %p1739_p7 = pnand %p1738_p6, %p1866_p4 }
 0x22f   : > { %p1744_p12 = por %p1743_p11, %p1742_p10 }
 0x230   : > { %p1740_p9 = pneg %p1739_p7 }
 0x231   : > { %p1746_p0 = por %p1745_p13, %p1744_p12 }
 0x233   : > { %p1747_p1 = pnand %p1746_p0, %p1740_p9 }
 0x235   : > { %1750 = shalt.err (!%p1747_p1)
}
 0x236   : > { %s1804_s29 = smov 128   ;;  %s1805_s4 = smov 8  }
 0x237   : > { %1650 = dma.vmem_to_hbm [thread:$0]  (%p1866_p4), %s2453_s6, 1024, %s2451_s8, %s2459_s15, %s1804_s29, %s1804_s29, %s1805_s4  }
 0x238 PF: > { %p1656_p2 = scmp.ge.s32.totalorder %s1801_s17, 2  ;;  %s1140_s5 = sand.u32 1, %s1781_s12  }
 0x239   : > { %s1141_s7 = scalar_lea.sflag [#allocation3], %s1140_s5 }
 0x23a   : > { %p1653_p3 = pnand %p1656_p2, %p1873_p8 }
 0x23c   : > { %1776 = dma.done.wait (!%p1653_p3), %s1141_s7, 1024  }
 0x23d   : > { %1778 = vsyncadd (!%p1653_p3), %s1141_s7, 4294966272  ;;  %s16_s17 = sadd.s32 1, %s1801_s17   ;;  %s2514_s12 = smov %s1785_s13 }
 0x23e   : > { %p13_p5 = scmp.ge.s32.totalorder %s16_s17, 4   ;;  %s2515_s13 = smov %s1789_s14 }
 0x23f   : > { %s2516_s14 = smov %s1879_s25  ;;  %s2517_s15 = smov %s1797_s16 }
 0x240   : > { %s2518_s16 = smov %s2520_s20  ;;  %15 = sbr.rel (!%p13_p5) target bundleno = 4 (0x4), region = 67 }
 0x247   :  { %1146 = vsyncpa [#allocation3], 1 }
 0x248   :  { %1148 = vsyncpa [#allocation3 + $0x1], 1 }

</bundles_post_ra>
